<compile_context>
chip_gen: v7x
topology: tpu7x:2x2x1
jax: 0.10.0
libtpu: 0.0.40
codegen_flags: <defaults>
</compile_context>

<pallas_src>
import functools

import jax
import jax.numpy as jnp
import numpy as np
from jax.experimental import pallas as pl
from jax.experimental.pallas import tpu as pltpu


_VMEM_LIMIT = 32 * 1024 * 1024          # scoped-VMEM budget (safe on v5e/v6e/v7x)
_SLAB_W = 128                           # lane-dense packed-output width
_COL_U0, _COL_U1, _COL_R, _COL_V, _COL_S = 0, 1, 2, 3, 4


def _round_up(x, m):
    return ((x + m - 1) // m) * m


def _cdiv(a, b):
    return -(-a // b)


# ---------------------------------------------------------------------------
# Kernel 1: per-sample NN + closed-form CLF-QP over one batch tile.
# ---------------------------------------------------------------------------
def _clf_qp_tile_kernel(
    clf_lambda, relax_penalty, hp, h_dim,
    # inputs
    x_ref,        # [TB, n_in]
    wbig_ref,     # [n_in, 6*hp]  fused, pre-transposed first-stage weights
    bbig_ref,     # [1, 6*hp]
    vw2t_ref,     # [hp, hp]      V layer-2 weight, [in, out] for the forward
    vb2_ref,      # [1, hp]
    vw2_ref,      # [hp, hp]      V layer-2 weight, [out, in] for the gradient
    dt_ref,       # [hp, 2]       Vw1_pad @ B_dyn
    # output
    out_ref,      # [TB, 128] slab: u0, u1, r, V, s, 0...
):
    x = x_ref[...]

    # One fused K=n_in matmul: [V | K1 | K2] first layers, the two controller
    # layer-2 projections against dx (x_goal folded into the bias), the
    # grad_V . f(x) projection, and (in lanes h_dim / h_dim+1 of the xe group)
    # the folded  dx.k1b2 - u_eq0  /  dx.k2b2 - u_eq1  terms.
    pre = jnp.dot(x, wbig_ref[...], preferred_element_type=jnp.float32) + bbig_ref[...]
    h1 = jnp.tanh(pre[:, 0 * hp:1 * hp])
    a1 = jnp.tanh(pre[:, 1 * hp:2 * hp])
    a2 = jnp.tanh(pre[:, 2 * hp:3 * hp])
    p1 = pre[:, 3 * hp:4 * hp]          # dx @ K1w2
    p2 = pre[:, 4 * hp:5 * hp]          # dx @ K2w2
    xe = pre[:, 5 * hp:6 * hp]          # lanes [0,H): x @ (Vw1 A).T; H/H+1: bias terms

    # ---- Lyapunov value and gradient projections ----
    h2 = jnp.tanh(jnp.dot(h1, vw2t_ref[...], preferred_element_type=jnp.float32)
                  + vb2_ref[...])
    V = 0.5 * jnp.sum(h2 * h2, axis=1, keepdims=True)                      # [TB, 1]

    t2 = h2 * (1.0 - h2 * h2)
    # g = h2 diag(1-h2^2) W2 diag(1-h1^2); grad_V = g @ W1 is never materialized.
    # g is exactly 0 on lanes >= h_dim, so the folded bias lanes of `xe` do not
    # contaminate LfV.
    g = jnp.dot(t2, vw2_ref[...], preferred_element_type=jnp.float32) * (1.0 - h1 * h1)

    LfV = jnp.sum(g * xe, axis=1, keepdims=True)                  # grad_V . f(x)
    # L_g_V as one tiny MXU matmul (relieves the contended XLU/vex slots).
    lgv = jnp.dot(g, dt_ref[...], preferred_element_type=jnp.float32)     # [TB, 2]
    LgV0 = lgv[:, 0:1]
    LgV1 = lgv[:, 1:2]

    # ---- nominal controller: u_learned = -K (x - x_goal) + u_eq ----
    c1 = xe[:, h_dim:h_dim + 1]          # dx . k1b2 - u_eq0 (from fused matmul)
    c2 = xe[:, h_dim + 1:h_dim + 2]      # dx . k2b2 - u_eq1
    un0 = -(jnp.sum(a1 * p1, axis=1, keepdims=True) + c1)
    un1 = -(jnp.sum(a2 * p2, axis=1, keepdims=True) + c2)

    # ---- closed-form CLF-QP (single scenario, no G_u / h_u) ----
    #   min ||u - u_nom||^2 + p*r   s.t.  LfV + LgV.u + lam*V <= r,  r >= 0
    c = LgV0 * un0 + LgV1 * un1 + LfV + clf_lambda * V
    a_sq = LgV0 * LgV0 + LgV1 * LgV1
    r2 = c - 0.5 * relax_penalty * a_sq
    s3 = c / (a_sq + 1e-12)   # safe: the r2 >= 0 branch captures a_sq -> 0, c > 0
    inactive = c <= 0.0
    u0 = jnp.where(inactive, un0,
                   jnp.where(r2 >= 0.0, un0 - 0.5 * relax_penalty * LgV0,
                             un0 - LgV0 * s3))
    u1 = jnp.where(inactive, un1,
                   jnp.where(r2 >= 0.0, un1 - 0.5 * relax_penalty * LgV1,
                             un1 - LgV1 * s3))
    r = jnp.where(inactive, jnp.zeros_like(c), jnp.maximum(r2, 0.0))

    s = LfV + LgV0 * u0 + LgV1 * u1     # L_f_V + L_g_V . u  (row term of Vdot)

    # ---- single unmasked 128-lane store (pack via VPU selects, not vst.msk) ----
    lane = jax.lax.broadcasted_iota(jnp.int32, out_ref.shape, 1)
    slab = jnp.where(lane == _COL_U0, u0, 0.0)
    slab = jnp.where(lane == _COL_U1, u1, slab)
    slab = jnp.where(lane == _COL_R, r, slab)
    slab = jnp.where(lane == _COL_V, V, slab)
    slab = jnp.where(lane == _COL_S, s, slab)
    out_ref[...] = slab


# ---------------------------------------------------------------------------
# Kernel 2: tiled O(B^2) Vdot = relu(s_i + lambda * V_j).
# ---------------------------------------------------------------------------
def _vdot_tile_kernel(clf_lambda, s_ref, vrow_ref, vdot_ref):
    # Faithful to the PyTorch [B,1,1] + [B] broadcast in forward(): off-diagonal
    # entries mix sample i's Lie derivatives with sample j's V.
    vdot_ref[...] = jnp.maximum(s_ref[...] + clf_lambda * vrow_ref[...], 0.0)


# ---------------------------------------------------------------------------
# Parameter preparation: zero-pad hidden dim to 128 lanes, pre-transpose and
# fuse weights into the layout the kernel consumes.  Exact (tanh(0) = 0, and
# zero-padded MXU columns produce exact zeros).
# ---------------------------------------------------------------------------
def prepare_kernel_params(params, hp):
    f32 = jnp.float32
    vw1 = params["vw1"].astype(f32)
    H, n_in = vw1.shape
    n_ctrl = params["B_dyn"].shape[1]
    assert n_ctrl == 2, "closed-form CLF-QP kernel assumes n_controls == 2"
    assert hp % 128 == 0 and hp >= H
    assert H + 2 <= hp, "need two free lanes in the xe group to fold k1b2/k2b2/u_eq"
    ph = hp - H

    def pad_rows(w):      # [H, k] -> [hp, k]
        return jnp.pad(w.astype(f32), ((0, ph), (0, 0)))

    def pad_cols(w):      # [k, H] -> [k, hp]
        return jnp.pad(w.astype(f32), ((0, 0), (0, ph)))

    vw1_p = pad_rows(vw1)                                             # [hp, n_in]
    vw2_p = jnp.pad(params["vw2"].astype(f32), ((0, ph), (0, ph)))    # [hp, hp]
    k1w1_p, k2w1_p = pad_rows(params["k1w1"]), pad_rows(params["k2w1"])
    k1w2_p, k2w2_p = pad_cols(params["k1w2"]), pad_cols(params["k2w2"])  # [n_in, hp]
    vb1_p, vb2_p = pad_cols(params["vb1"]), pad_cols(params["vb2"])
    k1b1_p, k2b1_p = pad_cols(params["k1b1"]), pad_cols(params["k2b1"])

    A = params["A_dyn"].astype(f32)
    Bd = params["B_dyn"].astype(f32)
    x_goal = params["x_goal"].astype(f32)
    u_eq = params["u_eq"].astype(f32)
    k1b2 = params["k1b2"].astype(f32)          # [1, n_in]
    k2b2 = params["k2b2"].astype(f32)

    # xe group: lanes [0:H) carry x @ (Vw1 A).T for L_f_V; lanes H / H+1 carry
    # the folded controller layer-2 bias terms  dx.k1b2 - u_eq0 / dx.k2b2 - u_eq1.
    xe_w = (vw1_p @ A).T                                              # [n_in, hp]
    xe_w = xe_w.at[:, H].set(k1b2[0]).at[:, H + 1].set(k2b2[0])
    xe_b = jnp.zeros((1, hp), f32)
    xe_b = xe_b.at[0, H].set(-(x_goal @ k1b2.T)[0, 0] - u_eq[0, 0])
    xe_b = xe_b.at[0, H + 1].set(-(x_goal @ k2b2.T)[0, 0] - u_eq[0, 1])

    w_big = jnp.concatenate(
        [vw1_p.T, k1w1_p.T, k2w1_p.T, k1w2_p, k2w2_p, xe_w], axis=1)  # [n_in, 6*hp]
    b_big = jnp.concatenate(
        [vb1_p, k1b1_p, k2b1_p,
         -(x_goal @ k1w2_p), -(x_goal @ k2w2_p), xe_b], axis=1)       # [1, 6*hp]

    return dict(
        w_big=w_big, b_big=b_big,
        vw2_t=vw2_p.T, vb2=vb2_p, vw2=vw2_p,
        dt=vw1_p @ Bd,                          # [hp, 2]
        h_dim=H,
    )


# ---------------------------------------------------------------------------
# Forward wrapper.
# ---------------------------------------------------------------------------
def clf_k_qp_forward(params, x, *, clf_lambda, clf_relaxation_penalty):
    """Forward pass matching CLF_K_QP_Net.forward for a single scenario with
    f(x) = A_dyn x, g(x) = B_dyn (constant) and no G_u / h_u constraints.
    Returns (u [B,2,1], relaxation [B,1], V [B], Vdot [B,1,B])."""
    B, n_in = x.shape
    n_ctrl = 2
    hp = _round_up(params["vw1"].shape[0], 128)
    kp = prepare_kernel_params(params, hp)
    h_dim = kp.pop("h_dim")

    # ---- kernel-1 batch tiling (rows: multiple of 8 sublanes) ----
    if B <= 256:
        tb = _round_up(B, 8)                               # single tile
    elif B <= 1024:
        tb = _round_up(_cdiv(B, 2), 8)                     # >=2 tiles: v7x megacore
    else:
        tb = _round_up(_cdiv(B, _cdiv(B, 512)), 8)         # ~512-row tiles
    b1_pad = _round_up(B, tb)
    grid_i = b1_pad // tb

    x_p = x.astype(jnp.float32)
    if b1_pad != B:
        x_p = jnp.pad(x_p, ((0, b1_pad - B), (0, 0)))

    def _resident(arr):   # full array, VMEM-resident across all grid steps
        nd = arr.ndim
        return pl.BlockSpec(arr.shape, lambda *_: (0,) * nd)

    weights = (kp["w_big"], kp["b_big"], kp["vw2_t"], kp["vb2"], kp["vw2"], kp["dt"])

    slab = pl.pallas_call(
        functools.partial(_clf_qp_tile_kernel,
                          float(clf_lambda), float(clf_relaxation_penalty),
                          hp, h_dim),
        out_shape=jax.ShapeDtypeStruct((b1_pad, _SLAB_W), jnp.float32),
        grid=(grid_i,),
        in_specs=[pl.BlockSpec((tb, n_in), lambda i: (i, 0))]
                 + [_resident(w) for w in weights],
        out_specs=pl.BlockSpec((tb, _SLAB_W), lambda i: (i, 0)),
        compiler_params=pltpu.CompilerParams(
            dimension_semantics=("parallel",),
            vmem_limit_bytes=_VMEM_LIMIT),
    )(x_p, *weights)

    # ---- kernel-2 (Vdot) tiling: decoupled from tb, lane-dense, v7x-VMEM-safe ----
    if B <= 1024:
        b2_pad = _round_up(B, 8)
        tv_r = tv_c = b2_pad                    # one full tile (<= 4 MiB f32)
    else:
        tv_r = 512
        b2_pad = _round_up(B, 512)
        tv_c = 1024 if b2_pad % 1024 == 0 else 512   # <= 2 MiB/block, 2x buffered

    s_col = jnp.pad(slab[:B, _COL_S:_COL_S + 1], ((0, b2_pad - B), (0, 0)))
    v_row = jnp.pad(slab[:B, _COL_V].reshape(1, B), ((0, 0), (0, b2_pad - B)))

    vdot_full = pl.pallas_call(
        functools.partial(_vdot_tile_kernel, float(clf_lambda)),
        out_shape=jax.ShapeDtypeStruct((b2_pad, b2_pad), jnp.float32),
        grid=(b2_pad // tv_r, b2_pad // tv_c),
        in_specs=[pl.BlockSpec((tv_r, 1), lambda i, j: (i, 0)),
                  pl.BlockSpec((1, tv_c), lambda i, j: (0, j))],
        out_specs=pl.BlockSpec((tv_r, tv_c), lambda i, j: (i, j)),
        compiler_params=pltpu.CompilerParams(
            dimension_semantics=("parallel", "parallel"),
            vmem_limit_bytes=_VMEM_LIMIT),
    )(s_col, v_row)

    u = slab[:B, _COL_U0:_COL_U1 + 1].reshape(B, n_ctrl, 1)
    relaxation = slab[:B, _COL_R:_COL_R + 1]        # n_scenarios == 1
    V_out = slab[:B, _COL_V]
    Vdot = vdot_full[:B, :B].reshape(B, 1, B)
    return u, relaxation, V_out, Vdot


# ---------------------------------------------------------------------------
# Pure-JAX reference (straightforward translation of the PyTorch module with
# the same closed-form QP) — used only to validate the kernels.
# ---------------------------------------------------------------------------
def reference_forward(params, x, *, clf_lambda, clf_relaxation_penalty):
    mm = functools.partial(jnp.dot, precision=jax.lax.Precision.HIGHEST)
    h1 = jnp.tanh(mm(x, params["vw1"].T) + params["vb1"])
    h2 = jnp.tanh(mm(h1, params["vw2"].T) + params["vb2"])
    V = 0.5 * jnp.sum(h2 * h2, axis=1, keepdims=True)
    t2 = h2 * (1.0 - h2 * h2)
    g = mm(t2, params["vw2"]) * (1.0 - h1 * h1)
    grad_V = mm(g, params["vw1"])
    a1 = jnp.tanh(mm(x, params["k1w1"].T) + params["k1b1"])
    K1 = mm(a1, params["k1w2"].T) + params["k1b2"]
    a2 = jnp.tanh(mm(x, params["k2w1"].T) + params["k2b1"])
    K2 = mm(a2, params["k2w2"].T) + params["k2b2"]
    dx = x - params["x_goal"]
    kdx = jnp.stack([jnp.sum(K1 * dx, axis=1), jnp.sum(K2 * dx, axis=1)], axis=1)
    u_nom = -kdx + params["u_eq"]
    f = mm(x, params["A_dyn"].T)
    LfV = jnp.sum(grad_V * f, axis=1, keepdims=True)
    LgV = mm(grad_V, params["B_dyn"])
    c = jnp.sum(LgV * u_nom, axis=1, keepdims=True) + LfV + clf_lambda * V
    a_sq = jnp.sum(LgV * LgV, axis=1, keepdims=True)
    r2 = c - 0.5 * clf_relaxation_penalty * a_sq
    u = jnp.where(c <= 0.0, u_nom,
                  jnp.where(r2 >= 0.0, u_nom - 0.5 * clf_relaxation_penalty * LgV,
                            u_nom - LgV * (c / (a_sq + 1e-12))))
    r = jnp.where(c <= 0.0, jnp.zeros_like(c), jnp.maximum(r2, 0.0))
    s = LfV + jnp.sum(LgV * u, axis=1, keepdims=True)
    Vdot = jnp.maximum(s + clf_lambda * V.T, 0.0)
    B = x.shape[0]
    return u.reshape(B, 2, 1), r, V.reshape(B), Vdot.reshape(B, 1, B)


def init_params(key, n_input, n_hidden, n_controls):
    """Deterministic, PyTorch-Linear-style uniform init of all parameters."""
    def linear(k, out_f, in_f):
        k1, k2 = jax.random.split(k)
        bound = 1.0 / (in_f ** 0.5)
        w = jax.random.uniform(k1, (out_f, in_f), jnp.float32, -bound, bound)
        b = jax.random.uniform(k2, (1, out_f), jnp.float32, -bound, bound)
        return w, b

    keys = jax.random.split(key, 10)
    vw1, vb1 = linear(keys[0], n_hidden, n_input)
    vw2, vb2 = linear(keys[1], n_hidden, n_hidden)
    k1w1, k1b1 = linear(keys[2], n_hidden, n_input)
    k1w2, k1b2 = linear(keys[3], n_input, n_hidden)
    k2w1, k2b1 = linear(keys[4], n_hidden, n_input)
    k2w2, k2b2 = linear(keys[5], n_input, n_hidden)

    # Simple deterministic control-affine dynamics: f(x) = A x, g(x) = B (constant).
    A_dyn = 0.1 * jax.random.normal(keys[6], (n_input, n_input), jnp.float32)
    B_dyn = 0.5 * jax.random.normal(keys[7], (n_input, n_controls), jnp.float32)

    x_goal = jnp.zeros((1, n_input), jnp.float32)
    u_eq = jnp.zeros((1, n_controls), jnp.float32)

    return dict(
        vw1=vw1, vb1=vb1, vw2=vw2, vb2=vb2,
        k1w1=k1w1, k1b1=k1b1, k1w2=k1w2, k1b2=k1b2,
        k2w1=k2w1, k2b1=k2b1, k2w2=k2w2, k2b2=k2b2,
        x_goal=x_goal, u_eq=u_eq, A_dyn=A_dyn, B_dyn=B_dyn,
    )


if __name__ == "__main__":
    n_input, n_hidden, n_controls = 4, 32, 2
    batch = 8
    clf_lambda = 1.0
    clf_relaxation_penalty = 10.0

    key = jax.random.PRNGKey(0)
    pkey, xkey = jax.random.split(key)
    params = init_params(pkey, n_input, n_hidden, n_controls)
    x = jax.random.normal(xkey, (batch, n_input), jnp.float32)

    u, relaxation, V, Vdot = clf_k_qp_forward(
        params, x,
        clf_lambda=clf_lambda,
        clf_relaxation_penalty=clf_relaxation_penalty,
    )
    jax.block_until_ready((u, relaxation, V, Vdot))

    assert u.shape == (batch, n_controls, 1)
    assert relaxation.shape == (batch, 1)
    assert V.shape == (batch,)
    assert Vdot.shape == (batch, 1, batch)

    # Validate against the pure-JAX reference.
    u_r, r_r, V_r, Vdot_r = reference_forward(
        params, x,
        clf_lambda=clf_lambda,
        clf_relaxation_penalty=clf_relaxation_penalty,
    )
    np.testing.assert_allclose(np.asarray(u), np.asarray(u_r), rtol=1e-3, atol=1e-3)
    np.testing.assert_allclose(np.asarray(relaxation), np.asarray(r_r), rtol=1e-3, atol=1e-3)
    np.testing.assert_allclose(np.asarray(V), np.asarray(V_r), rtol=1e-3, atol=1e-3)
    np.testing.assert_allclose(np.asarray(Vdot), np.asarray(Vdot_r), rtol=1e-3, atol=1e-3)

    print("KERNEL_OK")
</pallas_src>

<mosaic_0001>
module attributes {stable_mosaic.version = 11 : i64} {
  func.func @_clf_qp_tile_kernel(%arg0: i32, %arg1: memref<8x4xf32, #tpu.memory_space<vmem>>, %arg2: memref<4x768xf32, #tpu.memory_space<vmem>>, %arg3: memref<1x768xf32, #tpu.memory_space<vmem>>, %arg4: memref<128x128xf32, #tpu.memory_space<vmem>>, %arg5: memref<1x128xf32, #tpu.memory_space<vmem>>, %arg6: memref<128x128xf32, #tpu.memory_space<vmem>>, %arg7: memref<128x2xf32, #tpu.memory_space<vmem>>, %arg8: memref<8x128xf32, #tpu.memory_space<vmem>>) attributes {dimension_semantics = [#tpu.dimension_semantics<parallel>], iteration_bounds = array<i64: 1>, scalar_prefetch = 0 : i64, scratch_operands = 0 : i64, tpu.core_type = #tpu.core_type<tc>, window_params = [{transform_indices = @transform_0, window_bounds = array<i64: 8, 4>}, {pipeline_mode = #tpu.pipeline_mode<synchronous>, transform_indices = @transform_1, window_bounds = array<i64: 4, 768>}, {pipeline_mode = #tpu.pipeline_mode<synchronous>, transform_indices = @transform_2, window_bounds = array<i64: 1, 768>}, {pipeline_mode = #tpu.pipeline_mode<synchronous>, transform_indices = @transform_3, window_bounds = array<i64: 128, 128>}, {pipeline_mode = #tpu.pipeline_mode<synchronous>, transform_indices = @transform_4, window_bounds = array<i64: 1, 128>}, {pipeline_mode = #tpu.pipeline_mode<synchronous>, transform_indices = @transform_5, window_bounds = array<i64: 128, 128>}, {pipeline_mode = #tpu.pipeline_mode<synchronous>, transform_indices = @transform_6, window_bounds = array<i64: 128, 2>}, {transform_indices = @transform_7, window_bounds = array<i64: 8, 128>}]} {
    %c0 = arith.constant 0 : index
    %c0_0 = arith.constant 0 : index
    %0 = vector.load %arg1[%c0, %c0_0] : memref<8x4xf32, #tpu.memory_space<vmem>>, vector<8x4xf32>
    %c0_1 = arith.constant 0 : index
    %c0_2 = arith.constant 0 : index
    %1 = vector.load %arg2[%c0_1, %c0_2] : memref<4x768xf32, #tpu.memory_space<vmem>>, vector<4x768xf32>
    %cst = arith.constant dense<0.000000e+00> : vector<8x768xf32>
    %2 = tpu.matmul %0, %1, %cst {dimension_numbers = #tpu.dot_dimension_numbers<[1], [0], [0], [1], [0, 0, 1, 1], [], []>} : vector<8x4xf32>, vector<4x768xf32>, vector<8x768xf32> -> vector<8x768xf32>
    %c0_3 = arith.constant 0 : index
    %c0_4 = arith.constant 0 : index
    %3 = vector.load %arg3[%c0_3, %c0_4] : memref<1x768xf32, #tpu.memory_space<vmem>>, vector<1x768xf32>
    %4 = vector.broadcast %3 : vector<1x768xf32> to vector<8x768xf32>
    %5 = arith.addf %2, %4 : vector<8x768xf32>
    %6 = vector.extract_strided_slice %5 {offsets = [0, 0], sizes = [8, 128], strides = [1, 1]} : vector<8x768xf32> to vector<8x128xf32>
    %7 = math.tanh %6 : vector<8x128xf32>
    %8 = vector.extract_strided_slice %5 {offsets = [0, 128], sizes = [8, 128], strides = [1, 1]} : vector<8x768xf32> to vector<8x128xf32>
    %9 = math.tanh %8 : vector<8x128xf32>
    %10 = vector.extract_strided_slice %5 {offsets = [0, 256], sizes = [8, 128], strides = [1, 1]} : vector<8x768xf32> to vector<8x128xf32>
    %11 = math.tanh %10 : vector<8x128xf32>
    %12 = vector.extract_strided_slice %5 {offsets = [0, 384], sizes = [8, 128], strides = [1, 1]} : vector<8x768xf32> to vector<8x128xf32>
    %13 = vector.extract_strided_slice %5 {offsets = [0, 512], sizes = [8, 128], strides = [1, 1]} : vector<8x768xf32> to vector<8x128xf32>
    %14 = vector.extract_strided_slice %5 {offsets = [0, 640], sizes = [8, 128], strides = [1, 1]} : vector<8x768xf32> to vector<8x128xf32>
    %c0_5 = arith.constant 0 : index
    %c0_6 = arith.constant 0 : index
    %15 = vector.load %arg4[%c0_5, %c0_6] : memref<128x128xf32, #tpu.memory_space<vmem>>, vector<128x128xf32>
    %cst_7 = arith.constant dense<0.000000e+00> : vector<8x128xf32>
    %16 = tpu.matmul %7, %15, %cst_7 {dimension_numbers = #tpu.dot_dimension_numbers<[1], [0], [0], [1], [0, 0, 1, 1], [], []>} : vector<8x128xf32>, vector<128x128xf32>, vector<8x128xf32> -> vector<8x128xf32>
    %c0_8 = arith.constant 0 : index
    %c0_9 = arith.constant 0 : index
    %17 = vector.load %arg5[%c0_8, %c0_9] : memref<1x128xf32, #tpu.memory_space<vmem>>, vector<1x128xf32>
    %18 = vector.broadcast %17 : vector<1x128xf32> to vector<8x128xf32>
    %19 = arith.addf %16, %18 : vector<8x128xf32>
    %20 = math.tanh %19 : vector<8x128xf32>
    %21 = arith.mulf %20, %20 : vector<8x128xf32>
    %cst_10 = arith.constant dense<0.000000e+00> : vector<8xf32>
    %22 = vector.multi_reduction <add>, %21, %cst_10 [1] : vector<8x128xf32> to vector<8xf32>
    %23 = vector.shape_cast %22 : vector<8xf32> to vector<8x1xf32>
    %cst_11 = arith.constant 5.000000e-01 : f32
    %24 = vector.broadcast %cst_11 : f32 to vector<8x1xf32>
    %25 = arith.mulf %24, %23 : vector<8x1xf32>
    %26 = arith.mulf %20, %20 : vector<8x128xf32>
    %cst_12 = arith.constant 1.000000e+00 : f32
    %27 = vector.broadcast %cst_12 : f32 to vector<8x128xf32>
    %28 = arith.subf %27, %26 : vector<8x128xf32>
    %29 = arith.mulf %20, %28 : vector<8x128xf32>
    %c0_13 = arith.constant 0 : index
    %c0_14 = arith.constant 0 : index
    %30 = vector.load %arg6[%c0_13, %c0_14] : memref<128x128xf32, #tpu.memory_space<vmem>>, vector<128x128xf32>
    %cst_15 = arith.constant dense<0.000000e+00> : vector<8x128xf32>
    %31 = tpu.matmul %29, %30, %cst_15 {dimension_numbers = #tpu.dot_dimension_numbers<[1], [0], [0], [1], [0, 0, 1, 1], [], []>} : vector<8x128xf32>, vector<128x128xf32>, vector<8x128xf32> -> vector<8x128xf32>
    %32 = arith.mulf %7, %7 : vector<8x128xf32>
    %cst_16 = arith.constant 1.000000e+00 : f32
    %33 = vector.broadcast %cst_16 : f32 to vector<8x128xf32>
    %34 = arith.subf %33, %32 : vector<8x128xf32>
    %35 = arith.mulf %31, %34 : vector<8x128xf32>
    %36 = arith.mulf %35, %14 : vector<8x128xf32>
    %cst_17 = arith.constant dense<0.000000e+00> : vector<8xf32>
    %37 = vector.multi_reduction <add>, %36, %cst_17 [1] : vector<8x128xf32> to vector<8xf32>
    %38 = vector.shape_cast %37 : vector<8xf32> to vector<8x1xf32>
    %c0_18 = arith.constant 0 : index
    %c0_19 = arith.constant 0 : index
    %39 = vector.load %arg7[%c0_18, %c0_19] : memref<128x2xf32, #tpu.memory_space<vmem>>, vector<128x2xf32>
    %cst_20 = arith.constant dense<0.000000e+00> : vector<8x2xf32>
    %40 = tpu.matmul %35, %39, %cst_20 {dimension_numbers = #tpu.dot_dimension_numbers<[1], [0], [0], [1], [0, 0, 1, 1], [], []>} : vector<8x128xf32>, vector<128x2xf32>, vector<8x2xf32> -> vector<8x2xf32>
    %41 = vector.extract_strided_slice %40 {offsets = [0, 0], sizes = [8, 1], strides = [1, 1]} : vector<8x2xf32> to vector<8x1xf32>
    %42 = vector.extract_strided_slice %40 {offsets = [0, 1], sizes = [8, 1], strides = [1, 1]} : vector<8x2xf32> to vector<8x1xf32>
    %43 = vector.extract_strided_slice %14 {offsets = [0, 32], sizes = [8, 1], strides = [1, 1]} : vector<8x128xf32> to vector<8x1xf32>
    %44 = vector.extract_strided_slice %14 {offsets = [0, 33], sizes = [8, 1], strides = [1, 1]} : vector<8x128xf32> to vector<8x1xf32>
    %45 = arith.mulf %9, %12 : vector<8x128xf32>
    %cst_21 = arith.constant dense<0.000000e+00> : vector<8xf32>
    %46 = vector.multi_reduction <add>, %45, %cst_21 [1] : vector<8x128xf32> to vector<8xf32>
    %47 = vector.shape_cast %46 : vector<8xf32> to vector<8x1xf32>
    %48 = arith.addf %47, %43 : vector<8x1xf32>
    %cst_22 = arith.constant 0.000000e+00 : f32
    %49 = vector.broadcast %cst_22 : f32 to vector<8x1xf32>
    %50 = arith.subf %49, %48 : vector<8x1xf32>
    %51 = arith.mulf %11, %13 : vector<8x128xf32>
    %cst_23 = arith.constant dense<0.000000e+00> : vector<8xf32>
    %52 = vector.multi_reduction <add>, %51, %cst_23 [1] : vector<8x128xf32> to vector<8xf32>
    %53 = vector.shape_cast %52 : vector<8xf32> to vector<8x1xf32>
    %54 = arith.addf %53, %44 : vector<8x1xf32>
    %cst_24 = arith.constant 0.000000e+00 : f32
    %55 = vector.broadcast %cst_24 : f32 to vector<8x1xf32>
    %56 = arith.subf %55, %54 : vector<8x1xf32>
    %57 = arith.mulf %41, %50 : vector<8x1xf32>
    %58 = arith.mulf %42, %56 : vector<8x1xf32>
    %59 = arith.addf %57, %58 : vector<8x1xf32>
    %60 = arith.addf %59, %38 : vector<8x1xf32>
    %cst_25 = arith.constant 1.000000e+00 : f32
    %61 = vector.broadcast %cst_25 : f32 to vector<8x1xf32>
    %62 = arith.mulf %61, %25 : vector<8x1xf32>
    %63 = arith.addf %60, %62 : vector<8x1xf32>
    %64 = arith.mulf %41, %41 : vector<8x1xf32>
    %65 = arith.mulf %42, %42 : vector<8x1xf32>
    %66 = arith.addf %64, %65 : vector<8x1xf32>
    %cst_26 = arith.constant 5.000000e+00 : f32
    %67 = vector.broadcast %cst_26 : f32 to vector<8x1xf32>
    %68 = arith.mulf %67, %66 : vector<8x1xf32>
    %69 = arith.subf %63, %68 : vector<8x1xf32>
    %cst_27 = arith.constant 9.99999996E-13 : f32
    %70 = vector.broadcast %cst_27 : f32 to vector<8x1xf32>
    %71 = arith.addf %66, %70 : vector<8x1xf32>
    %72 = arith.divf %63, %71 : vector<8x1xf32>
    %cst_28 = arith.constant 0.000000e+00 : f32
    %73 = vector.broadcast %cst_28 : f32 to vector<8x1xf32>
    %74 = arith.cmpf ole, %63, %73 : vector<8x1xf32>
    %cst_29 = arith.constant 0.000000e+00 : f32
    %75 = vector.broadcast %cst_29 : f32 to vector<8x1xf32>
    %76 = arith.cmpf oge, %69, %75 : vector<8x1xf32>
    %cst_30 = arith.constant 5.000000e+00 : f32
    %77 = vector.broadcast %cst_30 : f32 to vector<8x1xf32>
    %78 = arith.mulf %77, %41 : vector<8x1xf32>
    %79 = arith.subf %50, %78 : vector<8x1xf32>
    %80 = arith.mulf %41, %72 : vector<8x1xf32>
    %81 = arith.subf %50, %80 : vector<8x1xf32>
    %82 = arith.select %76, %79, %81 : vector<8x1xi1>, vector<8x1xf32>
    %83 = arith.select %74, %50, %82 : vector<8x1xi1>, vector<8x1xf32>
    %cst_31 = arith.constant 0.000000e+00 : f32
    %84 = vector.broadcast %cst_31 : f32 to vector<8x1xf32>
    %85 = arith.cmpf oge, %69, %84 : vector<8x1xf32>
    %cst_32 = arith.constant 5.000000e+00 : f32
    %86 = vector.broadcast %cst_32 : f32 to vector<8x1xf32>
    %87 = arith.mulf %86, %42 : vector<8x1xf32>
    %88 = arith.subf %56, %87 : vector<8x1xf32>
    %89 = arith.mulf %42, %72 : vector<8x1xf32>
    %90 = arith.subf %56, %89 : vector<8x1xf32>
    %91 = arith.select %85, %88, %90 : vector<8x1xi1>, vector<8x1xf32>
    %92 = arith.select %74, %56, %91 : vector<8x1xi1>, vector<8x1xf32>
    %cst_33 = arith.constant 0.000000e+00 : f32
    %93 = vector.broadcast %cst_33 : f32 to vector<8x1xf32>
    %cst_34 = arith.constant 0.000000e+00 : f32
    %94 = vector.broadcast %cst_34 : f32 to vector<8x1xf32>
    %95 = arith.maximumf %69, %94 : vector<8x1xf32>
    %96 = arith.select %74, %93, %95 : vector<8x1xi1>, vector<8x1xf32>
    %97 = arith.mulf %41, %83 : vector<8x1xf32>
    %98 = arith.addf %38, %97 : vector<8x1xf32>
    %99 = arith.mulf %42, %92 : vector<8x1xf32>
    %100 = arith.addf %98, %99 : vector<8x1xf32>
    %101 = tpu.iota {dimensions = array<i32: 1>} : vector<8x128xi32>
    %c0_i32 = arith.constant 0 : i32
    %102 = vector.broadcast %c0_i32 : i32 to vector<8x128xi32>
    %103 = arith.cmpi eq, %101, %102 : vector<8x128xi32>
    %cst_35 = arith.constant 0.000000e+00 : f32
    %104 = vector.shape_cast %83 : vector<8x1xf32> to vector<8x1xf32>
    %105 = vector.broadcast %104 : vector<8x1xf32> to vector<8x128xf32>
    %106 = vector.broadcast %cst_35 : f32 to vector<8x128xf32>
    %107 = arith.select %103, %105, %106 : vector<8x128xi1>, vector<8x128xf32>
    %c1_i32 = arith.constant 1 : i32
    %108 = vector.broadcast %c1_i32 : i32 to vector<8x128xi32>
    %109 = arith.cmpi eq, %101, %108 : vector<8x128xi32>
    %110 = vector.shape_cast %92 : vector<8x1xf32> to vector<8x1xf32>
    %111 = vector.broadcast %110 : vector<8x1xf32> to vector<8x128xf32>
    %112 = arith.select %109, %111, %107 : vector<8x128xi1>, vector<8x128xf32>
    %c2_i32 = arith.constant 2 : i32
    %113 = vector.broadcast %c2_i32 : i32 to vector<8x128xi32>
    %114 = arith.cmpi eq, %101, %113 : vector<8x128xi32>
    %115 = vector.shape_cast %96 : vector<8x1xf32> to vector<8x1xf32>
    %116 = vector.broadcast %115 : vector<8x1xf32> to vector<8x128xf32>
    %117 = arith.select %114, %116, %112 : vector<8x128xi1>, vector<8x128xf32>
    %c3_i32 = arith.constant 3 : i32
    %118 = vector.broadcast %c3_i32 : i32 to vector<8x128xi32>
    %119 = arith.cmpi eq, %101, %118 : vector<8x128xi32>
    %120 = vector.shape_cast %25 : vector<8x1xf32> to vector<8x1xf32>
    %121 = vector.broadcast %120 : vector<8x1xf32> to vector<8x128xf32>
    %122 = arith.select %119, %121, %117 : vector<8x128xi1>, vector<8x128xf32>
    %c4_i32 = arith.constant 4 : i32
    %123 = vector.broadcast %c4_i32 : i32 to vector<8x128xi32>
    %124 = arith.cmpi eq, %101, %123 : vector<8x128xi32>
    %125 = vector.shape_cast %100 : vector<8x1xf32> to vector<8x1xf32>
    %126 = vector.broadcast %125 : vector<8x1xf32> to vector<8x128xf32>
    %127 = arith.select %124, %126, %122 : vector<8x128xi1>, vector<8x128xf32>
    %c0_36 = arith.constant 0 : index
    %c0_37 = arith.constant 0 : index
    %128 = vector.load %arg8[%c0_36, %c0_37] : memref<8x128xf32, #tpu.memory_space<vmem>>, vector<8x128xf32>
    tpu.vector_store %arg8[%c0_36, %c0_37], %127 {strides = array<i32>} : memref<8x128xf32, #tpu.memory_space<vmem>>, vector<8x128xf32>,
    return
  }
  func.func @transform_0(%arg0: i32) -> (i32, i32) {
    %c0_i32 = arith.constant 0 : i32
    %c0_i32_0 = arith.constant 0 : i32
    return %arg0, %c0_i32 : i32, i32
  }
  func.func @transform_1(%arg0: i32) -> (i32, i32) {
    %c0_i32 = arith.constant 0 : i32
    %c0_i32_0 = arith.constant 0 : i32
    %c0_i32_1 = arith.constant 0 : i32
    return %c0_i32, %c0_i32_0 : i32, i32
  }
  func.func @transform_2(%arg0: i32) -> (i32, i32) {
    %c0_i32 = arith.constant 0 : i32
    %c0_i32_0 = arith.constant 0 : i32
    %c0_i32_1 = arith.constant 0 : i32
    return %c0_i32, %c0_i32_0 : i32, i32
  }
  func.func @transform_3(%arg0: i32) -> (i32, i32) {
    %c0_i32 = arith.constant 0 : i32
    %c0_i32_0 = arith.constant 0 : i32
    %c0_i32_1 = arith.constant 0 : i32
    return %c0_i32, %c0_i32_0 : i32, i32
  }
  func.func @transform_4(%arg0: i32) -> (i32, i32) {
    %c0_i32 = arith.constant 0 : i32
    %c0_i32_0 = arith.constant 0 : i32
    %c0_i32_1 = arith.constant 0 : i32
    return %c0_i32, %c0_i32_0 : i32, i32
  }
  func.func @transform_5(%arg0: i32) -> (i32, i32) {
    %c0_i32 = arith.constant 0 : i32
    %c0_i32_0 = arith.constant 0 : i32
    %c0_i32_1 = arith.constant 0 : i32
    return %c0_i32, %c0_i32_0 : i32, i32
  }
  func.func @transform_6(%arg0: i32) -> (i32, i32) {
    %c0_i32 = arith.constant 0 : i32
    %c0_i32_0 = arith.constant 0 : i32
    %c0_i32_1 = arith.constant 0 : i32
    return %c0_i32, %c0_i32_0 : i32, i32
  }
  func.func @transform_7(%arg0: i32) -> (i32, i32) {
    %c0_i32 = arith.constant 0 : i32
    %c0_i32_0 = arith.constant 0 : i32
    return %arg0, %c0_i32 : i32, i32
  }
}

</mosaic_0001>

<bundles_post_ra>
// kernel: tpu_custom_call.1
= control target key start
LH: loop header
LB: loop body
LE: loop exit
PB: predicated region body
PF: predicated region fallthrough
CT: control target
= control target key end

     0   :  { %12 = vsyncpa [#allocation3], 0  ;;  %s1405_s0 = inlined_call_operand.vmem [shape: f32[8,4], index: 0, kind: input, shape index: {}]   ;;  %s1406_s1 = inlined_call_operand.vmem [shape: f32[4,768], index: 1, kind: input, shape index: {}]   ;;  %s1407_s2 = inlined_call_operand.hbm [shape: f32[1,768], index: 2, kind: input, shape index: {}]   ;;  %s1408_s3 = inlined_call_operand.vmem [shape: f32[128,128], index: 3, kind: input, shape index: {}]   ;;  %s1409_s4 = inlined_call_operand.vmem [shape: f32[1,128], index: 4, kind: input, shape index: {}]   ;;  %s1410_s5 = inlined_call_operand.hbm [shape: f32[128,128], index: 5, kind: input, shape index: {}]   ;;  %s1411_s6 = inlined_call_operand.vmem [shape: f32[128,2], index: 6, kind: input, shape index: {}]   ;;  %s1412_s7 = inlined_call_operand.hbm [shape: f32[8,128], index: 7, kind: output, shape index: {}]  }
   0x1   :  { %13 = vsyncpa [#allocation6], 0 }
   0x2   :  { %14 = vsyncpa [#allocation4], 0  ;;  %s1093_s24 = smov [#allocation2]   ;;  %s1094_s26 = smov [#allocation5]  }
   0x3   :  { %s25_s25 = sshll.u32 %s1093_s24, 4  ;;  %s38_s27 = sshll.u32 %s1094_s26, 4  ;;  %s26_s25 = int_to_ptr.vmem [resolvable:$true] %s25_s25  ;;  %s1147_s27 = int_to_ptr.vmem [resolvable:$true] %s38_s27 }
   0x4   :  { %s1021_s30 = scalar_lea.hbm %s1407_s2, 96 }
   0x5   :  { %p1022_p0 = scmp.ne.s32.totalorder %s1407_s2, %s1021_s30  ;;  %p1025_p1 = scmp.lt.u32.totalorder %s1021_s30, %s1407_s2 }
   0x7   :  { %p1027_p2 = pnand %p1025_p1, %p1022_p0 }
   0x9   :  { %1030 = shalt.err (!%p1027_p2)
}
   0xa   :  { %s1031_s12 = scalar_lea.vmem %s26_s25, 96  ;;  %p1036_p4 = scmp.lt.s32.totalorder %s26_s25, %s26_s25 }
   0xb   :  { %p1032_p3 = scmp.ne.s32.totalorder %s26_s25, %s1031_s12  ;;  %p1037_p5 = scmp.lt.s32.totalorder %s1031_s12, %s1031_s12 }
   0xd   :  { %p1038_p6 = por %p1037_p5, %p1036_p4 }
   0xf   :  { %p1039_p7 = pnand %p1038_p6, %p1032_p3 }
  0x11   :  { %1042 = shalt.err (!%p1039_p7)
}
  0x12   :  { %28 = dma.hbm_to_vmem [thread:$0]  %s1407_s2, 96, %s26_s25, [#allocation3]  }
  0x13   :  { %s1043_s17 = scalar_lea.hbm %s1410_s5, 2048 }
  0x14   :  { %p1044_p8 = scmp.ne.s32.totalorder %s1410_s5, %s1043_s17  ;;  %p1047_p9 = scmp.lt.u32.totalorder %s1043_s17, %s1410_s5 }
  0x16   :  { %p1049_p10 = pnand %p1047_p9, %p1044_p8 }
  0x18   :  { %1052 = shalt.err (!%p1049_p10)
}
  0x19   :  { %s1053_s22 = scalar_lea.vmem %s1147_s27, 2048  ;;  %p1058_p12 = scmp.lt.s32.totalorder %s1147_s27, %s1147_s27 }
  0x1a   :  { %p1054_p11 = scmp.ne.s32.totalorder %s1147_s27, %s1053_s22  ;;  %p1059_p13 = scmp.lt.s32.totalorder %s1053_s22, %s1053_s22 }
  0x1c   :  { %p1060_p0 = por %p1059_p13, %p1058_p12 }
  0x1e   :  { %p1061_p1 = pnand %p1060_p0, %p1054_p11 }
  0x20   :  { %1064 = shalt.err (!%p1061_p1)
}
  0x21   :  { %s1095_s2 = smov 128   ;;  %s1096_s23 = smov 8  }
  0x22   :  { %44 = dma.hbm_to_vmem [thread:$0]  %s1410_s5, 2048, %s1147_s27, [#allocation6], %s1095_s2, %s1095_s2, %s1096_s23  }
  0x23   :  { %1087 = dma.done.wait [#allocation3], 96  }
  0x24   :  { %1088 = vsyncadd [#allocation3], 4294967200 }
  0x25   :  { %1089 = dma.done.wait [#allocation6], 2048  }
  0x26   :  { %1090 = vsyncadd [#allocation6], 4294965248  ;;  %v1097_v0 = vmov 0.0   ;;  %v1098_v1 = vmov 0.0|0.0   ;;  %v54_v2 = vld [vmem:[%s1406_s1] sm:$0xff]  ;;  %vm99_vm0 = vcmask 1043456   ;;  %v59_v33 = vlaneseq }
  0x27   :  { %176 = vmatprep.mubr.f32.mxu0 %v1097_v0  ;;  %920 = vmatprep.subr.bf16.mxu1 %v1098_v1  ;;  %v55_v3 = vld [vmem:[%s1406_s1 + $0x8] sm:$0xff]  ;;  %v92_v4 = vcombine.high %v54_v2, %v54_v2  ;;  %v56_v6 = vld [vmem:[%s1406_s1 + $0x10] sm:$0xff]  ;;  %v328_v7 = vld [vmem:[%s1408_s3] sm:$0xff]  ;;  %vm95_vm1 = vcmask 31744   ;;  %vm1099_vm2 = vmmov 0   ;;  %s1102_s19 = smov 32  }
  0x28   :  { %v93_v5 = vcombine.high %v55_v3, %v55_v3  ;;  %v329_v8 = vld [vmem:[%s1408_s3 + $0x8] sm:$0xff]  ;;  %v53_v9 = vld [vmem:[%s1405_s0] sm:$0xff]  ;;  %v330_v11 = vld [vmem:[%s1408_s3 + $0x10] sm:$0xff]  ;;  %v94_v13 = vcombine.high %v56_v6, %v56_v6  ;;  %847 = vmatprep.mubr.msk.f32.mxu1 %vm1099_vm2, %v1097_v0  ;;  %v1265_v34 = vshrl.u32 %v59_v33, 7  ;;  %s1104_s20 = smov 95  }
  0x29   :  { %v921_v10 = vpack.c.bf16 %v329_v8, %v328_v7  ;;  %v331_v12 = vld [vmem:[%s1408_s3 + $0x18] sm:$0xff]  ;;  %754 = vmatprep.subr.msk.mxu0 %vm99_vm0, %v92_v4  ;;  %v332_v15 = vld [vmem:[%s1408_s3 + $0x20] sm:$0xff]  ;;  %v333_v16 = vld [vmem:[%s1408_s3 + $0x28] sm:$0xff] }
  0x2a   :  { %755 = vmatpush1.msk.msra.mxu0 %vm99_vm0, %v54_v2  ;;  %v924_v14 = vpack.c.bf16 %v331_v12, %v330_v11  ;;  %v927_v17 = vpack.c.bf16 %v333_v16, %v332_v15  ;;  %v334_v18 = vld [vmem:[%s1408_s3 + $0x30] sm:$0xff]  ;;  %v335_v19 = vld [vmem:[%s1408_s3 + $0x38] sm:$0xff]  ;;  %v336_v21 = vld [vmem:[%s1408_s3 + $0x40] sm:$0xff]  ;;  %v61_v35 = vsub.s32 0, %v1265_v34  ;;  %v65_v37 = vsub.s32 1, %v1265_v34 }
  0x2b   :  { %922 = vmatpush3.bf16.msra.mxu1 %v921_v10  ;;  %756 = vmatmul.mubr.msk.f32.vlgmr.msra.gmra.mrb[0].mxu0 %vm95_vm1, %v53_v9  ;;  %v930_v20 = vpack.c.bf16 %v335_v19, %v334_v18  ;;  %v337_v22 = vld [vmem:[%s1408_s3 + $0x48] sm:$0xff]  ;;  %v338_v24 = vld [vmem:[%s1408_s3 + $0x50] sm:$0xff]  ;;  %v339_v25 = vld [vmem:[%s1408_s3 + $0x58] sm:$0xff]  ;;  %v69_v39 = vsub.s32 2, %v1265_v34  ;;  %v73_v46 = vsub.s32 3, %v1265_v34  ;;  %v77_v50 = vsub.s32 4, %v1265_v34 }
  0x2c   :  { %757 = vmatprep.subr.msk.mxu0 %vm99_vm0, %v93_v5  ;;  %247 = vmatprep.mubr.f32.mxu0 %v1097_v0  ;;  %v933_v23 = vpack.c.bf16 %v337_v22, %v336_v21  ;;  %v936_v26 = vpack.c.bf16 %v339_v25, %v338_v24  ;;  %v340_v27 = vld [vmem:[%s1408_s3 + $0x60] sm:$0xff]  ;;  %v341_v28 = vld [vmem:[%s1408_s3 + $0x68] sm:$0xff]  ;;  %v342_v30 = vld [vmem:[%s1408_s3 + $0x70] sm:$0xff] }
  0x2d   :  { %758 = vmatpush1.msk.msra.mxu0 %vm99_vm0, %v55_v3  ;;  %923 = vmatprep.subr.bf16.mxu1 %v1098_v1  ;;  %v939_v29 = vpack.c.bf16 %v341_v28, %v340_v27  ;;  %v343_v31 = vld [vmem:[%s1408_s3 + $0x78] sm:$0xff]  ;;  %v1268_v36 = vld [vmem:[#allocation2] sm:$0x3f]  ;;  %v428_v62 = vld [vmem:[#allocation5] sm:$0xff]  ;;  %s1100_s3 = smov 96  }
  0x2e   :  { %760 = vmatprep.subr.msk.mxu0 %vm99_vm0, %v94_v13  ;;  %v942_v32 = vpack.c.bf16 %v343_v31, %v342_v30  ;;  %v62_v38 = vrot.slane %v1268_v36, %v61_v35  ;;  %v66_v40 = vrot.slane %v1268_v36, %v65_v37  ;;  %v70_v44 = vrot.slane %v1268_v36, %v69_v39  ;;  %v429_v63 = vld [vmem:[#allocation5 + $0x8] sm:$0xff]  ;;  %v430_v2 = vld [vmem:[#allocation5 + $0x10] sm:$0xff]  ;;  %v431_v4 = vld [vmem:[#allocation5 + $0x18] sm:$0xff] }
  0x2f   :  { %925 = vmatpush3.bf16.msra.mxu1 %v924_v14  ;;  %759 = vmatmul.mubr.msk.f32.vlgmr.msra.gmra.mrb[2].mxu0 %vm95_vm1, %v53_v9  ;;  %v74_v51 = vrot.slane %v1268_v36, %v73_v46  ;;  %v78_v53 = vrot.slane %v1268_v36, %v77_v50  ;;  %v945_v3 = vpack.c.bf16 %v429_v63, %v428_v62  ;;  %v433_v7 = vld [vmem:[#allocation5 + $0x28] sm:$0xff]  ;;  %v436_v11 = vld [vmem:[#allocation5 + $0x40] sm:$0xff]  ;;  %v438_v14 = vld [vmem:[#allocation5 + $0x50] sm:$0xff] }
  0x30   :  { %926 = vmatprep.subr.bf16.mxu1 %v1098_v1  ;;  %761 = vmatpush1.msk.msra.mxu0 %vm99_vm0, %v56_v6  ;;  %v948_v5 = vpack.c.bf16 %v431_v4, %v430_v2  ;;  %v432_v6 = vld [vmem:[#allocation5 + $0x20] sm:$0xff]  ;;  %v437_v12 = vld [vmem:[#allocation5 + $0x48] sm:$0xff]  ;;  %v439_v15 = vld [vmem:[#allocation5 + $0x58] sm:$0xff] }
  0x31   :  { %318 = vmatprep.mubr.f32.mxu0 %v1097_v0  ;;  %944 = vmatprep.subr.bf16.mxu0 %v1098_v1  ;;  %v951_v8 = vpack.c.bf16 %v433_v7, %v432_v6  ;;  %v957_v13 = vpack.c.bf16 %v437_v12, %v436_v11  ;;  %v960_v16 = vpack.c.bf16 %v439_v15, %v438_v14  ;;  %v441_v18 = vld [vmem:[#allocation5 + $0x68] sm:$0xff]  ;;  %v443_v21 = vld [vmem:[#allocation5 + $0x78] sm:$0xff] }
  0x32   :  { %v521_v39 = vld [vmem:[%s1411_s6 + $0x8] sm:$0xff]  ;;  %v528_v50 = vld [vmem:[%s1411_s6 + $0x40] sm:$0xff] }
  0x33   :  { %928 = vmatpush3.bf16.msra.mxu1 %v927_v17  ;;  %762 = vmatmul.mubr.msk.f32.vlgmr.msra.gmra.mrb[4].mxu0 %vm95_vm1, %v53_v9  ;;  %v435_v9 = vld [vmem:[#allocation5 + $0x38] sm:$0xff]  ;;  %v440_v17 = vld [vmem:[#allocation5 + $0x60] sm:$0xff] }
  0x34   :  { %929 = vmatprep.subr.bf16.mxu1 %v1098_v1  ;;  %882 = vmatprep.mubr.msk.f32.mxu0 %vm1099_vm2, %v1097_v0  ;;  %v963_v19 = vpack.c.bf16 %v441_v18, %v440_v17 }
  0x35   :  { %946 = vmatpush3.bf16.msra.mxu0 %v945_v3 }
  0x36   :  { %947 = vmatprep.subr.bf16.mxu0 %v1098_v1 }
  0x37   :  { %931 = vmatpush3.bf16.msra.mxu1 %v930_v20  ;;  %v442_v20 = vld [vmem:[#allocation5 + $0x70] sm:$0xff] }
  0x38   :  { %932 = vmatprep.subr.bf16.mxu1 %v1098_v1  ;;  %v966_v22 = vpack.c.bf16 %v443_v21, %v442_v20 }
  0x39   :  { %949 = vmatpush3.bf16.msra.mxu0 %v948_v5 }
  0x3a   :  { %950 = vmatprep.subr.bf16.mxu0 %v1098_v1 }
  0x3b   :  { %934 = vmatpush3.bf16.msra.mxu1 %v933_v23  ;;  %v81_v23 = vsub.s32 5, %v1265_v34 }
  0x3c   :  { %935 = vmatprep.subr.bf16.mxu1 %v1098_v1 }
  0x3d   :  { %952 = vmatpush3.bf16.msra.mxu0 %v951_v8  ;;  %v82_v24 = vrot.slane %v1268_v36, %v81_v23 }
  0x3e   :  { %953 = vmatprep.subr.bf16.mxu0 %v1098_v1 }
  0x3f   :  { %937 = vmatpush3.bf16.msra.mxu1 %v936_v26 }
  0x40   :  { %938 = vmatprep.subr.bf16.mxu1 %v1098_v1 }
  0x43   :  { %940 = vmatpush3.bf16.msra.mxu1 %v939_v29  ;;  %v763_v29 = vld [vmem:[%s1409_s4] ss:$0 sm:$0xff]  ;;  %s1103_s4 = smov 1  }
  0x44   :  { %941 = vmatprep.subr.bf16.mxu1 %v1098_v1 }
  0x47   :  { %943 = vmatpush3.bf16.msra.mxu1 %v942_v32 }
  0x48   :  { %968 = vmatprep.subr.bf16.mxu1 %v1098_v1 }
  0xfe   :  { %v178_v41 = vpop.f32.mrb[0].mxu0 }
  0xff   :  { %v179_v42 = vadd.f32 %v178_v41, %v62_v38  ;;  %v180_v43 = vpop.f32.mrb[1].mxu0  ;;  %v520_v38 = vld [vmem:[%s1411_s6] sm:$0xff] }
 0x100   :  { %v181_v45 = vadd.f32 %v180_v43, %v66_v40  ;;  %v522_v40 = vld [vmem:[%s1411_s6 + $0x10] sm:$0xff]  ;;  %v969_v41 = vpack.c.bf16 %v521_v39, %v520_v38  ;;  %v1105_v39 = vmov 0  }
 0x101   :  { %1011 = vtanh.f32 %v179_v42  ;;  %v523_v42 = vld [vmem:[%s1411_s6 + $0x18] sm:$0xff]  ;;  %1007 = vset.pattern.permute.xlu0 %v1105_v39  ;;  %1006 = vset.pattern.permute.xlu1 %v1105_v39 }
 0x102   :  { %1013 = vtanh.f32 %v181_v45  ;;  %v249_v47 = vpop.f32.mrb[2].mxu0  ;;  %v972_v43 = vpack.c.bf16 %v523_v42, %v522_v40  ;;  %v525_v45 = vld [vmem:[%s1411_s6 + $0x28] sm:$0xff] }
 0x103   :  { %v250_v48 = vadd.f32 %v249_v47, %v70_v44  ;;  %v251_v49 = vpop.f32.mrb[3].mxu0  ;;  %v524_v44 = vld [vmem:[%s1411_s6 + $0x20] sm:$0xff]  ;;  %v526_v47 = vld [vmem:[%s1411_s6 + $0x30] sm:$0xff] }
 0x104   :  { %v252_v54 = vadd.f32 %v251_v49, %v74_v51  ;;  %v975_v46 = vpack.c.bf16 %v525_v45, %v524_v44  ;;  %v529_v51 = vld [vmem:[%s1411_s6 + $0x48] sm:$0xff] }
 0x105   :  { %1015 = vtanh.f32 %v250_v48  ;;  %v527_v48 = vld [vmem:[%s1411_s6 + $0x38] sm:$0xff] }
 0x106   :  { %v320_v52 = vpop.f32.mrb[4].mxu0  ;;  %v978_v49 = vpack.c.bf16 %v527_v48, %v526_v47 }
 0x107   :  { %v321_v57 = vadd.f32 %v320_v52, %v78_v53  ;;  %v322_v61 = vpop.f32.mrb[5].mxu0  ;;  %v981_v52 = vpack.c.bf16 %v529_v51, %v528_v50  ;;  %v530_v53 = vld [vmem:[%s1411_s6 + $0x50] sm:$0xff] }
 0x108   :  { %v1293_v25 = vadd.f32 %v322_v61, %v82_v24  ;;  %v535_v61 = vld [vmem:[%s1411_s6 + $0x78] sm:$0xff] }
 0x10b   :  { %v1279_v55 = vpop.eup %1011 }
 0x10c   :  { %v1014_v56 = vpop.eup %1013  ;;  %848 = vmatmul.mubr.f32.vlgmr.msra.gmra.mrb[0].mxu1 %v1279_v55  ;;  %v514_v63 = vmul.f32 %v1279_v55, %v1279_v55 }
 0x10d   :  { %v606_v58 = vmul.f32 %v1014_v56, %v252_v54  ;;  %917 = vmatprep.mubr.msk.f32.mxu1 %vm1099_vm2, %v1097_v0  ;;  %v434_v0 = vld [vmem:[#allocation5 + $0x30] sm:$0xff]  ;;  %970 = vmatpush3.bf16.msra.mxu1 %v969_v41 }
 0x10e   :  { %v954_v10 = vpack.c.bf16 %v435_v9, %v434_v0  ;;  %971 = vmatprep.subr.bf16.mxu1 %v1098_v1  ;;  %v531_v54 = vld [vmem:[%s1411_s6 + $0x58] sm:$0xff]  ;;  %v515_v2 = vsub.f32 1.0, %v514_v63 }
 0x10f   :  { %v1016_v59 = vpop.eup %1015  ;;  %v984_v56 = vpack.c.bf16 %v531_v54, %v530_v53 }
 0x110   :  { %v611_v60 = vmul.f32 %v1016_v59, %v321_v57  ;;  %955 = vmatpush3.bf16.msra.mxu0 %v954_v10  ;;  %v532_v57 = vld [vmem:[%s1411_s6 + $0x60] sm:$0xff] }
 0x111   :  { %956 = vmatprep.subr.bf16.mxu0 %v1098_v1  ;;  %973 = vmatpush3.bf16.msra.mxu1 %v972_v43 }
 0x112   :  { %612 = vadd.xlane.f32.xlu0 %v611_v60  ;;  %974 = vmatprep.subr.bf16.mxu1 %v1098_v1  ;;  %v534_v60 = vld [vmem:[%s1411_s6 + $0x70] sm:$0xff] }
 0x113   :  { %v990_v62 = vpack.c.bf16 %v535_v61, %v534_v60 }
 0x114   :  { %958 = vmatpush3.bf16.msra.mxu0 %v957_v13 }
 0x115   :  { %959 = vmatprep.subr.bf16.mxu0 %v1098_v1  ;;  %976 = vmatpush3.bf16.msra.mxu1 %v975_v46 }
 0x116   :  { %607 = vadd.xlane.f32.xlu0 %v606_v58  ;;  %977 = vmatprep.subr.bf16.mxu1 %v1098_v1  ;;  %v533_v58 = vld [vmem:[%s1411_s6 + $0x68] sm:$0xff]  ;;  %s1101_s6 = smov 127  }
 0x117   :  { %v987_v59 = vpack.c.bf16 %v533_v58, %v532_v57 }
 0x118   :  { %961 = vmatpush3.bf16.msra.mxu0 %v960_v16 }
 0x119   :  { %962 = vmatprep.subr.bf16.mxu0 %v1098_v1  ;;  %979 = vmatpush3.bf16.msra.mxu1 %v978_v49 }
 0x11a   :  { %980 = vmatprep.subr.bf16.mxu1 %v1098_v1 }
 0x11c   :  { %964 = vmatpush3.bf16.msra.mxu0 %v963_v19 }
 0x11d   :  { %965 = vmatprep.subr.bf16.mxu0 %v1098_v1  ;;  %982 = vmatpush3.bf16.msra.mxu1 %v981_v52 }
 0x11e   :  { %983 = vmatprep.subr.bf16.mxu1 %v1098_v1 }
 0x120   :  { %967 = vmatpush3.bf16.msra.mxu0 %v966_v22 }
 0x121   :  { %985 = vmatpush3.bf16.msra.mxu1 %v984_v56 }
 0x122   :  { %986 = vmatprep.subr.bf16.mxu1 %v1098_v1 }
 0x125   :  { %988 = vmatpush3.bf16.msra.mxu1 %v987_v59  ;;  %v707_v59 = vand.u32 127, %v59_v33 }
 0x126   :  { %989 = vmatprep.subr.bf16.mxu1 %v1098_v1 }
 0x127   :  { %vm708_vm5 = vcmp.eq.s32.totalorder %v707_v59, 0  ;;  %vm715_vm6 = vcmp.eq.s32.totalorder %v707_v59, 1  ;;  %vm721_vm7 = vcmp.eq.s32.totalorder %v707_v59, 2  ;;  %vm728_vm8 = vcmp.eq.s32.totalorder %v707_v59, 3 }
 0x128   :  { %vm730_vm9 = vcmp.eq.s32.totalorder %v707_v59, 4 }
 0x129   :  { %991 = vmatpush3.bf16.msra.mxu1 %v990_v62 }
 0x19f   :  { %v613_v26 = vpop.xlane.xlu0 %612 }
 0x1a0   :  { %v614_v27 = vadd.f32 %v613_v26, %v1293_v25 }
 0x1a2   :  { %v1296_v28 = vsub.f32 0.0, %v614_v27 }
 0x1a3   :  { %v608_v6 = vpop.xlane.xlu0 %607 }
 0x1a4   :  { %622 = vrot.lane.b32.xlu1 %v1296_v28, %s1100_s3  ;;  %v609_v8 = vadd.f32 %v608_v6, %v1293_v25 }
 0x1a6   :  { %v610_v55 = vsub.f32 0.0, %v609_v8 }
 0x1df   :  { %v417_v30 = vpop.f32.mrb[0].mxu1 }
 0x1e0   :  { %v418_v31 = vadd.f32 %v763_v29, %v417_v30  ;;  %v849_v32 = vpop.f32.mrb[1].mxu1 }
 0x1e2   :  { %1017 = vtanh.f32 %v418_v31 }
 0x1ec   :  { %v1018_v34 = vpop.eup %1017 }
 0x1ed   :  { %v422_v35 = vmul.f32 %v1018_v34, %v1018_v34 }
 0x1ef   :  { %423 = vadd.xlane.f32.xlu1 %v422_v35  ;;  %v426_v36 = vsub.f32 1.0, %v422_v35 }
 0x1f1   :  { %v427_v37 = vmul.f32 %v1018_v34, %v426_v36 }
 0x1f3   :  { %883 = vmatmul.mubr.f32.vlgmr.msra.gmra.mrb[6].mxu0 %v427_v37 }
 0x216   :  { %v623_v10 = vpop.permute.xlu1 %622 }
 0x27c   :  { %v424_v19 = vpop.xlane.xlu1 %423 }
 0x27d   :  { %v1373_v22 = vmul.f32 0.5, %v424_v19 }
 0x2c6   :  { %v510_v3 = vpop.f32.mrb[6].mxu0 }
 0x2c7   :  { %v516_v4 = vmul.f32 %v515_v2, %v510_v3  ;;  %v884_v5 = vpop.f32.mrb[7].mxu0 }
 0x2c9   :  { %918 = vmatmul.mubr.f32.vlgmr.msra.gmra.mrb[2].mxu1 %v516_v4  ;;  %v517_v1 = vmul.f32 %v516_v4, %v1293_v25 }
 0x2cb   :  { %518 = vadd.xlane.f32.xlu0 %v517_v1 }
 0x358   :  { %v519_v13 = vpop.xlane.xlu0 %518 }
 0x39c   :  { %v1361_v7 = vpop.f32.mrb[2].mxu1 }
 0x39d   :  { %v919_v0 = vpop.f32.mrb[3].mxu1  ;;  %v633_v9 = vmul.f32 %v1361_v7, %v1361_v7  ;;  %v625_v11 = vmul.f32 %v623_v10, %v1361_v7  ;;  %v646_v12 = vmul.f32 5.0, %v1361_v7 }
 0x39f   :  { %635 = vrot.lane.b32.xlu0 %v633_v9, %s1101_s6 }
 0x3a3   :  { %617 = vrot.lane.b32.xlu0 %v610_v55, %s1100_s3 }
 0x3a7   :  { %627 = vrot.lane.b32.xlu0 %v625_v11, %s1101_s6 }
 0x3ab   :  { %648 = vrot.lane.b32.xlu0 %v646_v12, %s1102_s19 }
 0x411   :  { %v636_v14 = vpop.permute.xlu0 %635 }
 0x412   :  { %v638_v15 = vadd.f32 %v636_v14, %v633_v9 }
 0x414   :  { %v641_v16 = vadd.f32 1e-12, %v638_v15  ;;  %v639_v24 = vmul.f32 5.0, %v638_v15 }
 0x415   :  { %v618_v17 = vpop.permute.xlu0 %617 }
 0x416   :  { %1019 = vrcp.f32 %v641_v16  ;;  %v620_v18 = vmul.f32 %v618_v17, %v1361_v7 }
 0x419   :  { %v628_v20 = vpop.permute.xlu0 %627 }
 0x41a   :  { %v630_v21 = vadd.f32 %v628_v20, %v620_v18 }
 0x41c   :  { %v631_v23 = vadd.f32 %v630_v21, %v519_v13 }
 0x41d   :  { %v649_v34 = vpop.permute.xlu0 %648 }
 0x41e   :  { %v632_v25 = vadd.f32 %v631_v23, %v1373_v22  ;;  %v668_v35 = vsub.f32 %v1296_v28, %v649_v34  ;;  %v651_v38 = vsub.f32 %v610_v55, %v649_v34 }
 0x420   :  { %v1020_v26 = vpop.eup %1019  ;;  %v640_v27 = vsub.f32 %v632_v25, %v639_v24  ;;  %vm644_vm4 = vcmp.le.f32.partialorder %v632_v25, 0.0 }
 0x421   :  { %v643_v29 = vmul.f32 %v1020_v26, %v632_v25 }
 0x422   :  { %vm645_vm3 = vcmp.ge.f32.partialorder %v640_v27, 0.0  ;;  %v692_v52 = vmax.f32 %v640_v27, 0.0 }
 0x423   :  { %670 = vrot.lane.b32.xlu1 %v643_v29, %s1103_s4  ;;  %v652_v30 = vmul.f32 %v643_v29, %v1361_v7 }
 0x424   :  { %v693_v54 = vsel %vm644_vm4, 0.0, %v692_v52 }
 0x427   :  { %688 = vrot.lane.b32.xlu1 %v1296_v28, %s1104_s20 }
 0x495   :  { %v671_v31 = vpop.permute.xlu1 %670 }
 0x496   :  { %v673_v32 = vmul.f32 %v671_v31, %v1361_v7 }
 0x498   :  { %675 = vrot.lane.b32.xlu0 %v673_v32, %s1102_s19 }
 0x499   :  { %v689_v42 = vpop.permute.xlu1 %688 }
 0x49c   :  { %680 = vrot.lane.b32.xlu0 %v668_v35, %s1104_s20 }
 0x50a   :  { %v676_v36 = vpop.permute.xlu0 %675 }
 0x50b   :  { %v678_v37 = vsub.f32 %v1296_v28, %v676_v36 }
 0x50d   :  { %684 = vrot.lane.b32.xlu0 %v678_v37, %s1104_s20 }
 0x50e   :  { %v681_v40 = vpop.permute.xlu0 %680 }
 0x511   :  { %654 = vrot.lane.b32.xlu0 %v652_v30, %s1102_s19 }
 0x515   :  { %659 = vrot.lane.b32.xlu0 %v651_v38, %s1100_s3 }
 0x57f   :  { %v685_v41 = vpop.permute.xlu0 %684 }
 0x580   :  { %v687_v43 = vsel %vm645_vm3, %v681_v40, %v685_v41 }
 0x581   :  { %v691_v44 = vsel %vm644_vm4, %v689_v42, %v687_v43 }
 0x582   :  { %697 = vrot.lane.b32.xlu1 %v691_v44, %s1103_s4 }
 0x583   :  { %v655_v45 = vpop.permute.xlu0 %654 }
 0x584   :  { %v657_v28 = vsub.f32 %v610_v55, %v655_v45 }
 0x586   :  { %663 = vrot.lane.b32.xlu1 %v657_v28, %s1100_s3  ;;  %s1106_s3 = smov [#allocation7]  }
 0x587   :  { %v660_v48 = vpop.permute.xlu0 %659  ;;  %s744_s21 = sshll.u32 %s1106_s3, 4  ;;  %s745_s21 = int_to_ptr.vmem [resolvable:$true] %s744_s21 }
 0x588   :  { %s1065_s22 = scalar_lea.vmem %s745_s21, 128  ;;  %p1070_p3 = scmp.lt.s32.totalorder %s745_s21, %s745_s21 }
 0x589   :  { %p1066_p2 = scmp.ne.s32.totalorder %s745_s21, %s1065_s22  ;;  %p1071_p4 = scmp.lt.s32.totalorder %s1065_s22, %s1065_s22 }
 0x58b   :  { %p1072_p5 = por %p1071_p4, %p1070_p3 }
 0x58d   :  { %p1073_p6 = pnand %p1072_p5, %p1066_p2 }
 0x5f4   :  { %v698_v46 = vpop.permute.xlu1 %697 }
 0x5f5   :  { %v700_v47 = vmul.f32 %v698_v46, %v1361_v7 }
 0x5f7   :  { %702 = vrot.lane.b32.xlu0 %v700_v47, %s1101_s6 }
 0x5f8   :  { %v664_v49 = vpop.permute.xlu1 %663 }
 0x5f9   :  { %v666_v50 = vsel %vm645_vm3, %v660_v48, %v664_v49 }
 0x5fa   :  { %v667_v51 = vsel %vm644_vm4, %v618_v17, %v666_v50 }
 0x5fb   :  { %717 = vperm.xlu0 %1007, %v691_v44   ;;  %711 = vperm.xlu1 %1006, %v667_v51   ;;  %v694_v53 = vmul.f32 %v667_v51, %v1361_v7 }
 0x5fd   :  { %v695_v56 = vadd.f32 %v694_v53, %v519_v13 }
 0x5ff   :  { %724 = vperm.xlu1 %1006, %v693_v54  }
 0x669   :  { %v703_v57 = vpop.permute.xlu0 %702 }
 0x66a   :  { %v705_v58 = vadd.f32 %v703_v57, %v695_v56 }
 0x66c   :  { %733 = vperm.xlu1 %1006, %v705_v58  }
 0x67a   :  { %v712_v60 = vpop.permute.xlu1 %711  ;;  %v718_v62 = vpop.permute.xlu0 %717 }
 0x67b   :  { %v714_v61 = vsel %vm708_vm5, %v712_v60, 0.0 }
 0x67c   :  { %v720_v2 = vsel %vm715_vm6, %v718_v62, %v714_v61 }
 0x67e   :  { %v725_v63 = vpop.permute.xlu1 %724 }
 0x67f   :  { %v727_v3 = vsel %vm721_vm7, %v725_v63, %v720_v2 }
 0x680   :  { %v729_v5 = vsel %vm728_vm8, %v1373_v22, %v727_v3 }
 0x6eb   :  { %v734_v4 = vpop.permute.xlu1 %733 }
 0x6ec   :  { %v736_v1 = vsel %vm730_vm9, %v734_v4, %v729_v5 }
 0x6ed   :  { %737 = vst [vmem:[#allocation7] sm:$0xff] %v736_v1 }
 0x6ee   :  { %1076 = shalt.err (!%p1073_p6)
}
 0x6ef   :  { %s1077_s24 = scalar_lea.hbm %s1412_s7, 128 }
 0x6f0   :  { %p1078_p7 = scmp.ne.s32.totalorder %s1412_s7, %s1077_s24  ;;  %p1081_p8 = scmp.lt.u32.totalorder %s1077_s24, %s1412_s7 }
 0x6f2   :  { %p1083_p9 = pnand %p1081_p8, %p1078_p7 }
 0x6f4   :  { %1086 = shalt.err (!%p1083_p9)
}
 0x6f5   :  { %747 = dma.vmem_to_hbm [thread:$0]  %s745_s21, 128, %s1412_s7, [#allocation4]  }
 0x6f6   :  { %1091 = dma.done.wait [#allocation4], 128  }
 0x6f7   :  { %1092 = vsyncadd [#allocation4], 4294967168 }
 0x6f8   :  { %751 = vsyncpa [#allocation3], 1 }
 0x6f9   :  { %752 = vsyncpa [#allocation6], 1 }
 0x6fa   :  { %753 = vsyncpa [#allocation4], 1 }

</bundles_post_ra>
